<compile_context>
chip_gen: v6e
topology: v6e:2x2x1
jax: 0.10.0
libtpu: 0.0.40
codegen_flags: <defaults>
</compile_context>

<pallas_src>
import functools

import jax
import jax.numpy as jnp
from jax.experimental import pallas as pl
from jax.experimental.pallas import tpu as pltpu


def _pad_mask_kernel(x_ref, o_ref, *, pad_idx: int):
    """One grid step writes one (batch, query-tile) block of the mask.

    x_ref: (1, 1, K) int32       -- sentinel-prepended token ids for this batch row
    o_ref: (1, TQ, K) bool/int8  -- output mask tile
    """
    row = (x_ref[...] == pad_idx).astype(o_ref.dtype)   # (1, 1, K)
    o_ref[...] = jnp.broadcast_to(row, o_ref.shape)     # (1, TQ, K)


def _target_block_bytes(device_kind: str) -> int:
    """Output-block byte target per TPU generation (pure HBM-writeback kernel)."""
    kind = (device_kind or "").lower()
    if "7" in kind:                        # v7x: 3.2 TB/s HBM, 64 MiB physical VMEM
        return 12 << 20
    if "v6" in kind:                       # v6e: ~1.4 TB/s, 128 MiB physical VMEM
        return 8 << 20
    if "v5e" in kind or "lite" in kind:    # v5e: 16 MiB default scoped VMEM
        return 6 << 20
    if "v5" in kind:                       # v5p
        return 8 << 20
    return 4 << 20                         # v4 / unknown / interpret: conservative


def _choose_tq(seq_len: int, k_total: int, target_block_bytes: int) -> int:
    """Query-axis tile: 32-sublane aligned (packed bool/int8 tile is (32,128)),
    as large as the block-byte budget allows, preferring an even divisor of S."""
    tq_cap = max(32, (target_block_bytes // max(k_total, 1)) // 32 * 32)
    if seq_len <= tq_cap:
        return seq_len        # full query axis in one block (full-dim => always legal)
    div = 0
    for cand in range(tq_cap, 31, -32):
        if seq_len % cand == 0:
            div = cand
            break
    # Prefer a divisor (no ragged tail block) unless it more than halves the tile.
    return div if div * 2 >= tq_cap else tq_cap


def _pad_masking_impl(x: jax.Array, pad_idx: int, offset: int, out_dtype) -> jax.Array:
    orig_shape = x.shape
    seq_len = int(orig_shape[-1])
    batch_shape = orig_shape[:-1]
    b = 1
    for d in batch_shape:
        b *= int(d)

    k_total = seq_len + offset

    # Glue on the tiny input: flatten leading dims and prepend `offset` sentinel
    # (guaranteed non-pad) tokens so the first `offset` mask columns come out
    # False with no in-kernel lane-axis concatenate.
    x2 = x.reshape(b, seq_len).astype(jnp.int32)
    if offset > 0:
        sentinel = jnp.full((b, offset), pad_idx ^ 1, dtype=jnp.int32)
        x2 = jnp.concatenate([sentinel, x2], axis=-1)
    x2 = x2.reshape(b, 1, k_total)

    dev = jax.devices()[0]
    target_block_bytes = _target_block_bytes(getattr(dev, "device_kind", ""))
    tq = _choose_tq(seq_len, k_total, target_block_bytes)
    grid_q = pl.cdiv(seq_len, tq)

    # Explicit VMEM budget: double-buffered output block + double-buffered input
    # row + slack.  Independent of any generation's default scoped-VMEM limit.
    block_bytes = tq * k_total * jnp.dtype(out_dtype).itemsize
    vmem_limit = int(2 * block_bytes + 2 * k_total * 4 + (4 << 20))

    # Put the larger parallel extent first so megacore / dual-TC sharding has an
    # axis to split even when b == 1 (input re-fetch per step is negligible).
    if grid_q >= b:
        grid = (grid_q, b)
        in_index = lambda q, i: (i, 0, 0)
        out_index = lambda q, i: (i, q, 0)
    else:
        grid = (b, grid_q)
        in_index = lambda i, q: (i, 0, 0)
        out_index = lambda i, q: (i, q, 0)

    out = pl.pallas_call(
        functools.partial(_pad_mask_kernel, pad_idx=pad_idx),
        out_shape=jax.ShapeDtypeStruct((b, seq_len, k_total), out_dtype),
        grid_spec=pltpu.PrefetchScalarGridSpec(
            num_scalar_prefetch=0,
            grid=grid,
            in_specs=[pl.BlockSpec((1, 1, k_total), in_index)],
            out_specs=pl.BlockSpec((1, tq, k_total), out_index),
        ),
        compiler_params=pltpu.CompilerParams(
            dimension_semantics=("parallel", "parallel"),
            vmem_limit_bytes=vmem_limit),
        cost_estimate=pl.CostEstimate(
            flops=0,
            transcendentals=0,
            # ~pure HBM writeback: B*S*(S+offset) bytes out, tiny int32 in.
            bytes_accessed=b * seq_len * k_total + b * k_total * 4),
    )(x2)

    return out.reshape(batch_shape + (seq_len, k_total))


def _reference(x: jax.Array, pad_idx: int, offset: int = 0) -> jax.Array:
    """Pure-JAX port of the PyTorch forward for verification."""
    mask = (x == pad_idx)[..., None, :]                       # (..., 1, S)
    padding = jnp.zeros(x.shape[:-1] + (1, offset), jnp.bool_)
    mask = jnp.concatenate([padding, mask], axis=-1)          # (..., 1, S+offset)
    return jnp.broadcast_to(mask, x.shape + (mask.shape[-1],))


@functools.lru_cache(maxsize=None)
def _bool_output_supported(platform: str, device_kind: str) -> bool:
    """Cheap, backend-keyed probe: does Mosaic accept a bool VMEM kernel output
    (and store correct values) on this backend?  Otherwise fall back to int8."""
    del platform, device_kind  # cache keys only
    try:
        x = (jnp.arange(8, dtype=jnp.int32) % 3).reshape(1, 8)
        got = jax.block_until_ready(_pad_masking_impl(x, 0, 4, jnp.bool_))
        exp = _reference(x, 0, 4)
        return bool(jnp.array_equal(got, exp))
    except Exception:
        return False


def pad_masking(x: jax.Array, pad_idx: int, offset: int = 0) -> jax.Array:
    """Create the padding mask of shape x.shape + (seq_len + offset,), dtype bool."""
    dev = jax.devices()[0]
    if _bool_output_supported(dev.platform, getattr(dev, "device_kind", "")):
        return _pad_masking_impl(x, pad_idx, offset, jnp.bool_)
    # TODO(synk): if Mosaic bool outputs are unavailable, prefer returning the
    # int8 mask and fusing the `!= 0` into the downstream attention kernel; the
    # astype below is a full extra HBM read+write pass over the mask.
    return _pad_masking_impl(x, pad_idx, offset, jnp.int8).astype(jnp.bool_)


if __name__ == "__main__":
    pad_idx = 0
    offset = 4
    batch, seq_len = 2, 8

    key = jax.random.PRNGKey(0)
    k0, k1 = jax.random.split(key)
    # token ids in [0, 5); pad_idx=0 appears with decent probability
    x = jax.random.randint(k0, (batch, seq_len), minval=0, maxval=5, dtype=jnp.int32)

    out = jax.block_until_ready(pad_masking(x, pad_idx, offset))
    ref = _reference(x, pad_idx, offset)
    assert out.shape == (batch, seq_len, seq_len + offset), out.shape
    assert out.dtype == jnp.bool_, out.dtype
    assert bool(jnp.array_equal(out, ref)), "mismatch vs reference (offset>0)"

    # offset = 0 path
    out0 = jax.block_until_ready(pad_masking(x, pad_idx, 0))
    assert bool(jnp.array_equal(out0, _reference(x, pad_idx, 0))), "mismatch (offset=0)"

    # extra leading dims + seq multiple of 8 (flattening + sublane-aligned path)
    x3 = jax.random.randint(k1, (2, 3, 16), minval=0, maxval=4, dtype=jnp.int32)
    out3 = jax.block_until_ready(pad_masking(x3, pad_idx, 0))
    assert out3.shape == (2, 3, 16, 16), out3.shape
    assert bool(jnp.array_equal(out3, _reference(x3, pad_idx, 0))), "mismatch (3-D batch)"

    print("KERNEL_OK")
</pallas_src>

<mosaic_0001>
module attributes {stable_mosaic.version = 11 : i64} {
  func.func @_pad_mask_kernel(%arg0: i32, %arg1: i32, %arg2: memref<1x1x12xi32, #tpu.memory_space<vmem>>, %arg3: memref<1x8x12xi32, #tpu.memory_space<vmem>>) attributes {dimension_semantics = [#tpu.dimension_semantics<parallel>, #tpu.dimension_semantics<parallel>], iteration_bounds = array<i64: 1, 1>, scalar_prefetch = 0 : i64, scratch_operands = 0 : i64, tpu.core_type = #tpu.core_type<tc>, window_params = [{transform_indices = @transform_0, window_bounds = array<i64: 1, 1, 12>}, {transform_indices = @transform_1, window_bounds = array<i64: 1, 8, 12>}]} {
    %c0 = arith.constant 0 : index
    %c0_0 = arith.constant 0 : index
    %c0_1 = arith.constant 0 : index
    %0 = vector.load %arg2[%c0, %c0_0, %c0_1] : memref<1x1x12xi32, #tpu.memory_space<vmem>>, vector<1x1x12xi32>
    %c0_i32 = arith.constant 0 : i32
    %1 = vector.broadcast %c0_i32 : i32 to vector<1x1x12xi32>
    %2 = arith.cmpi eq, %0, %1 : vector<1x1x12xi32>
    %3 = vector.shape_cast %2 : vector<1x1x12xi1> to vector<1x1x12xi1>
    %4 = vector.broadcast %3 : vector<1x1x12xi1> to vector<1x8x12xi1>
    %c0_2 = arith.constant 0 : index
    %c0_3 = arith.constant 0 : index
    %c0_4 = arith.constant 0 : index
    %5 = vector.load %arg3[%c0_2, %c0_3, %c0_4] : memref<1x8x12xi32, #tpu.memory_space<vmem>>, vector<1x8x12xi32>
    %6 = arith.extui %4 : vector<1x8x12xi1> to vector<1x8x12xi32>
    %cst = arith.constant dense<0> : vector<1x8x12xi32>
    %7 = arith.cmpi ne, %5, %cst : vector<1x8x12xi32>
    tpu.vector_store %arg3[%c0_2, %c0_3, %c0_4], %6 {strides = array<i32>} : memref<1x8x12xi32, #tpu.memory_space<vmem>>, vector<1x8x12xi32>,
    return
  }
  func.func @transform_0(%arg0: i32, %arg1: i32) -> (i32, i32, i32) {
    %c0_i32 = arith.constant 0 : i32
    %c0_i32_0 = arith.constant 0 : i32
    %c0_i32_1 = arith.constant 0 : i32
    return %arg1, %c0_i32, %c0_i32_0 : i32, i32, i32
  }
  func.func @transform_1(%arg0: i32, %arg1: i32) -> (i32, i32, i32) {
    %c0_i32 = arith.constant 0 : i32
    %c0_i32_0 = arith.constant 0 : i32
    return %arg1, %arg0, %c0_i32 : i32, i32, i32
  }
}

module attributes {stable_mosaic.version = 11 : i64} {
  func.func @_pad_mask_kernel(%arg0: i32, %arg1: i32, %arg2: memref<1x1x12xi32, #tpu.memory_space<vmem>>, %arg3: memref<1x8x12xi8, #tpu.memory_space<vmem>>) attributes {dimension_semantics = [#tpu.dimension_semantics<parallel>, #tpu.dimension_semantics<parallel>], iteration_bounds = array<i64: 2, 1>, scalar_prefetch = 0 : i64, scratch_operands = 0 : i64, tpu.core_type = #tpu.core_type<tc>, window_params = [{transform_indices = @transform_0, window_bounds = array<i64: 1, 1, 12>}, {transform_indices = @transform_1, window_bounds = array<i64: 1, 8, 12>}]} {
    %c0 = arith.constant 0 : index
    %c0_0 = arith.constant 0 : index
    %c0_1 = arith.constant 0 : index
    %0 = vector.load %arg2[%c0, %c0_0, %c0_1] : memref<1x1x12xi32, #tpu.memory_space<vmem>>, vector<1x1x12xi32>
    %c0_i32 = arith.constant 0 : i32
    %1 = vector.broadcast %c0_i32 : i32 to vector<1x1x12xi32>
    %2 = arith.cmpi eq, %0, %1 : vector<1x1x12xi32>
    %3 = arith.extui %2 : vector<1x1x12xi1> to vector<1x1x12xi8>
    %4 = vector.shape_cast %3 : vector<1x1x12xi8> to vector<1x1x12xi8>
    %5 = vector.broadcast %4 : vector<1x1x12xi8> to vector<1x8x12xi8>
    %c0_2 = arith.constant 0 : index
    %c0_3 = arith.constant 0 : index
    %c0_4 = arith.constant 0 : index
    %6 = vector.load %arg3[%c0_2, %c0_3, %c0_4] : memref<1x8x12xi8, #tpu.memory_space<vmem>>, vector<1x8x12xi8>
    tpu.vector_store %arg3[%c0_2, %c0_3, %c0_4], %5 {strides = array<i32>} : memref<1x8x12xi8, #tpu.memory_space<vmem>>, vector<1x8x12xi8>,
    return
  }
  func.func @transform_0(%arg0: i32, %arg1: i32) -> (i32, i32, i32) {
    %c0_i32 = arith.constant 0 : i32
    %c0_i32_0 = arith.constant 0 : i32
    %c0_i32_1 = arith.constant 0 : i32
    return %arg0, %c0_i32, %c0_i32_0 : i32, i32, i32
  }
  func.func @transform_1(%arg0: i32, %arg1: i32) -> (i32, i32, i32) {
    %c0_i32 = arith.constant 0 : i32
    %c0_i32_0 = arith.constant 0 : i32
    return %arg0, %arg1, %c0_i32 : i32, i32, i32
  }
}

</mosaic_0001>

<bundles_post_ra>
// kernel: tpu_custom_call.1
= control target key start
LH: loop header
LB: loop body
LE: loop exit
PB: predicated region body
PF: predicated region fallthrough
CT: control target
= control target key end

     0   :  { %6 = vsyncpa [#allocation3], 0  ;;  %s60_s6 = smov [#allocation2]   ;;  %s78_s0 = inlined_call_operand.hbm [shape: s32[1,1,12], index: 0, kind: input, shape index: {}]   ;;  %s79_s1 = inlined_call_operand.vmem [shape: s32[1,8,12], index: 1, kind: output, shape index: {}]  }
   0x1   :  { %s13_s7 = sshll.u32 %s60_s6, 4  ;;  %s14_s7 = int_to_ptr.vmem [resolvable:$true] %s13_s7 }
   0x2   :  { %s46_s8 = scalar_lea.vmem %s14_s7, 16  ;;  %s50_s9 = scalar_lea.vmem %s14_s7, 32 }
   0x3   :  { %p47_p0 = scmp.ne.s32.totalorder %s14_s7, %s46_s8  ;;  %p51_p1 = scmp.lt.s32.totalorder %s14_s7, %s14_s7 }
   0x4   :  { %p52_p2 = scmp.lt.s32.totalorder %s50_s9, %s46_s8 }
   0x6   :  { %p53_p3 = por %p52_p2, %p51_p1 }
   0x8   :  { %p54_p4 = pnand %p53_p3, %p47_p0 }
   0xa   :  { %57 = shalt.err (!%p54_p4)
}
   0xb   :  { %16 = dma.hbm_to_vmem [thread:$0]  %s78_s0, 16, %s14_s7, [#allocation3]  }
   0xc   :  { %58 = dma.done.wait [#allocation3], 16  }
   0xd   :  { %59 = vsyncadd [#allocation3], 4294967280  ;;  %v23_v0 = vlaneseq  ;;  %v20_v3 = vld [vmem:[#allocation2] sm:$0x1]  ;;  %v61_v4 = vmov 0   ;;  %vm29_vm1 = vcmask 97280  }
   0xe   :  { %vm21_vm0 = vcmp.eq.s32.totalorder %v20_v3, 0 }
   0xf   :  { %v24_v1 = vshrl.u32 %v23_v0, 7  ;;  %v22_v5 = vsel %vm21_vm0, 1, %v61_v4 }
  0x11   :  { %v25_v2 = vsub.s32 0, %v24_v1 }
  0x13   :  { %v26_v6 = vrot.slane %v22_v5, %v25_v2 }
  0x15   :  { %vm27_vm2 = vcmp.eq.s32.totalorder %v26_v6, 1 }
  0x16   :  { %v28_v7 = vsel %vm27_vm2, 1, %v61_v4 }
  0x17   :  { %30 = vst.msk [vmem:[%s79_s1] sm:$0xff] %vm29_vm1, %v28_v7 }
  0x18   :  { %35 = vsyncpa [#allocation3], 1 }

// kernel: tpu_custom_call.1
= control target key start
LH: loop header
LB: loop body
LE: loop exit
PB: predicated region body
PF: predicated region fallthrough
CT: control target
= control target key end

     0   :  { %6 = vsyncpa [#allocation3], 0  ;;  %s584_s0 = inlined_call_operand.hbm [shape: s32[2,1,12], index: 0, kind: input, shape index: {}]   ;;  %s585_s1 = inlined_call_operand.hbm [shape: s8[2,8,12], index: 1, kind: output, shape index: {}]  }
   0x1   :  { %8 = vsyncpa [#allocation3 + $0x1], 0 }
   0x2   :  { %9 = vsyncpa [#allocation4], 0 }
   0x3   :  { %11 = vsyncpa [#allocation4 + $0x1], 0  ;;  %s449_s6 = smov 0   ;;  %s451_s7 = smov 0  }
   0x4   :  { %s453_s8 = smov 0   ;;  %s455_s9 = smov 0  }
   0x5   :  { %s457_s10 = smov 0   ;;  %s459_s11 = smov 0  }
   0x6 LB: > { %s252_s12 = sadd.s32 4294967295, %s434_s11   ;;  %s253_s13 = sadd.s32 4294967294, %s434_s11   ;;  %s434_s11 = sphi %s459_s11, %s17_s11   ;;  %s430_s10 = sphi %s457_s10, %s597_s10   ;;  %s426_s9 = sphi %s455_s9, %s596_s9   ;;  %s422_s8 = sphi %s453_s8, %s595_s8   ;;  %s418_s7 = sphi %s451_s7, %s594_s7   ;;  %s414_s6 = sphi %s449_s6, %s593_s6  }
   0x7   : > { %s29_s14 = sadd.s32 1, %s430_s10  ;;  %s36_s15 = sadd.s32 1, %s422_s8 }
   0x8   : > { %p31_p0 = scmp.ge.s32.totalorder %s29_s14, 2  ;;  %p43_p1 = scmp.ne.s32.totalorder %s422_s8, %s418_s7 }
   0x9   : > { %p44_p2 = scmp.eq.s32.totalorder %s434_s11, 0  ;;  %p49_p3 = scmp.ne.s32.totalorder %s418_s7, %s414_s6 }
   0xa   : > { %s599_s14 = smov (%p31_p0, %s29_s14), 0  ;;  %p50_p5 = scmp.eq.s32.totalorder %s252_s12, 0 }
   0xb   : > { %p490_p4 = por %p44_p2, %p43_p1  ;;  %s33_s17 = ssub.s32 %s430_s10, %s599_s14 }
   0xc   : > { %p75_p6 = scmp.eq.s32.totalorder %s252_s12, 1  ;;  %p34_p7 = scmp.eq.s32.totalorder %s33_s17, 0 }
   0xd   : > { %p496_p8 = por %p50_p5, %p49_p3  ;;  %p81_p10 = scmp.eq.s32.totalorder %s253_s13, 1 }
   0xe   : > { %p500_p9 = por %p75_p6, %p43_p1  ;;  %p275_p13 = scmp.lt.s32.totalorder %s434_s11, 2 }
   0xf   : > { %s505_s20 = scalar_select %p34_p7, %s422_s8, %s36_s15  }
  0x10   : > { %p507_p11 = por %p81_p10, %p49_p3  ;;  %s101_s22 = sand.u32 1, %s422_s8  }
  0x11   : > { %s256_s23 = sshll.u32 %s430_s10, 4  ;;  %s104_s24 = scalar_lea.vmem [#allocation2], %s101_s22 }
  0x12   : > { %s589_s21 = scalar_select %p507_p11, 1, 0 }
  0x13   : > { %s111_s25 = sshll.u32 %s104_s24, 4  ;;  %s109_s28 = scalar_lea.hbm %s584_s0, %s256_s23  ;;  %s112_s25 = int_to_ptr.vmem [resolvable:$true] %s111_s25 }
  0x14   : > { %p520_p0 = pnand %p275_p13, %p490_p4  ;;  %p257_p1 = scmp.ge.s32.totalorder %s434_s11, 1 }
  0x15   : > { %p116_p2 = scmp.lt.s32.totalorder %s434_s11, 3  ;;  %s102_s30 = scalar_lea.sflag [#allocation3], %s101_s22 }
  0x16   : > { %p328_p3 = pneg %p520_p0  ;;  %s339_s2 = scalar_lea.vmem %s112_s25, 16 }
  0x17   : > { %p340_p5 = scmp.ne.s32.totalorder %s112_s25, %s339_s2  ;;  %s436_s3 = smov [#allocation2]  }
  0x18   : > { %s344_s4 = sshll.u32 %s436_s3, 4  ;;  %s345_s4 = int_to_ptr.vmem [resolvable:$false] %s344_s4 }
  0x19   : > { %p342_p6 = pnand %p340_p5, %p328_p3  ;;  %s346_s5 = scalar_lea.vmem %s345_s4, 32 }
  0x1a   : > { %p347_p10 = scmp.lt.s32.totalorder %s112_s25, %s345_s4  ;;  %p348_p12 = scmp.lt.s32.totalorder %s346_s5, %s339_s2 }
  0x1b   : > { %p343_p7 = pneg %p342_p6 }
  0x1c   : > { %p349_p4 = por %p348_p12, %p347_p10 }
  0x1e   : > { %p350_p13 = pnand %p349_p4, %p343_p7 }
  0x20   : > { %353 = shalt.err (!%p350_p13)
}
  0x21   : > { %270 = dma.hbm_to_vmem [thread:$0]  (!%p520_p0), %s109_s28, 16, %s112_s25, %s102_s30  }
  0x22   : > { %p117_p11 = pnand %p257_p1, %p116_p2 }
  0x23   : > { %s535_s12 = sand.u32 (!%p117_p11), 1, %s418_s7  }
  0x24   : > { %120 = sbr.rel (%p117_p11) target bundleno = 70 (0x46), region = 24  ;;  %s123_s13 = scalar_lea.sflag (!%p117_p11), [#allocation3], %s535_s12 }
  0x25   : > { %s125_s15 = scalar_lea.vmem (!%p117_p11), [#allocation2], %s535_s12 }
  0x29   : > { %405 = dma.done.wait (%p496_p8), %s123_s13, 16  }
  0x2a   : > { %407 = vsyncadd (%p496_p8), %s123_s13, 4294967280  ;;  %v145_v0 = vld [vmem:[%s125_s15] sm:$0x1]  ;;  %v155_v1 = vlaneseq  ;;  %v437_v2 = vmov 0   ;;  %s258_s16 = sshll.u32 %s535_s12, 1  ;;  %s260_s22 = sshll.u32 %s426_s9, 5 }
  0x2b   : > { %vm146_vm0 = vcmp.eq.s32.totalorder %v145_v0, 0  ;;  %s142_s17 = scalar_lea.vmem [#allocation5], %s258_s16  ;;  %vm159_vm2 = vcmask 91136   ;;  %s174_s25 = scalar_lea.hbm %s585_s1, %s260_s22 }
  0x2c   : > { %v147_v3 = vsel %vm146_vm0, 1, %v437_v2  ;;  %v156_v6 = vshrl.u32 %v155_v1, 7  ;;  %s176_s18 = sshll.u32 %s142_s17, 4  ;;  %s162_s26 = scalar_lea.sflag [#allocation4], %s535_s12  ;;  %s177_s18 = int_to_ptr.vmem [resolvable:$true] %s176_s18 }
  0x2d   : > { %v148_v4 = vpack.c.b16 %v147_v3, %v147_v3  ;;  %s354_s27 = scalar_lea.vmem %s177_s18, 32  ;;  %s438_s28 = smov [#allocation5]  }
  0x2e   : > { %v157_v9 = vsub.s32 0, %v156_v6  ;;  %p355_p8 = scmp.ne.s32.totalorder %s177_s18, %s354_s27  ;;  %s358_s29 = sshll.u32 %s438_s28, 4  ;;  %s359_s29 = int_to_ptr.vmem [resolvable:$false] %s358_s29 }
  0x2f   : > { %v149_v5 = vpack.c.b8 %v148_v4, %v148_v4  ;;  %s360_s30 = scalar_lea.vmem %s359_s29, 64  ;;  %p361_p0 = scmp.lt.s32.totalorder %s177_s18, %s359_s29 }
  0x30   : > { %p356_p11 = pnand %p355_p8, %p500_p9  ;;  %p362_p1 = scmp.lt.s32.totalorder %s360_s30, %s354_s27 }
  0x31   : > { %vm150_vm1 = vnez %v149_v5 }
  0x32   : > { %v151_v7 = vsel %vm150_vm1, 16843009, %v437_v2  ;;  %p357_p12 = pneg %p356_p11  ;;  %p363_p2 = por %p362_p1, %p361_p0 }
  0x33   : > { %v153_v8 = vpack.i.b16 %v151_v7, %v151_v7 }
  0x34   : > { %p364_p3 = pnand %p363_p2, %p357_p12 }
  0x35   : > { %v154_v10 = vpack.i.b8 %v153_v8, %v153_v8 }
  0x37   : > { %v158_v11 = vrot.slane %v154_v10, %v157_v9 }
  0x39   : > { %160 = vst.msk [vmem:[%s142_s17] sm:$0x3] %vm159_vm2, %v158_v11 }
  0x3a   : > { %367 = shalt.err (!%p364_p3)
}
  0x3b   : > { %s368_s9 = scalar_lea.hbm %s174_s25, 32  ;;  %s372_s4 = scalar_lea.hbm %s585_s1, 64 }
  0x3c   : > { %p369_p5 = scmp.ne.s32.totalorder %s174_s25, %s368_s9  ;;  %p373_p10 = scmp.lt.s32.totalorder %s174_s25, %s585_s1 }
  0x3d   : > { %p374_p4 = scmp.lt.s32.totalorder %s372_s4, %s368_s9 }
  0x3e   : > { %p370_p6 = pnand %p369_p5, %p500_p9 }
  0x3f   : > { %p375_p13 = por %p374_p4, %p373_p10 }
  0x40   : > { %p371_p7 = pneg %p370_p6 }
  0x42   : > { %p376_p8 = pnand %p375_p13, %p371_p7 }
  0x44   : > { %379 = shalt.err (!%p376_p8)
}
  0x45   : > { %265 = dma.vmem_to_hbm [thread:$0]  (%p500_p9), %s177_s18, 32, %s174_s25, %s162_s26  }
  0x46 PF: > { %s188_s13 = sand.u32 1, %s414_s6   ;;  %p591_p11 = scmp.ne.s32.totalorder %s589_s21, 0 }
  0x47   : > { %p592_p12 = scmp.ge.s32.totalorder %s434_s11, 2  ;;  %s189_s15 = scalar_lea.sflag [#allocation4], %s188_s13 }
  0x49   : > { %p272_p0 = pnand %p592_p12, %p591_p11 }
  0x4b   : > { %p273_p1 = pneg %p272_p0 }
  0x4d   : > { %409 = dma.done.wait (%p273_p1), %s189_s15, 32  }
  0x4e   : > { %411 = vsyncadd (%p273_p1), %s189_s15, 4294967264  ;;  %s17_s11 = sadd.s32 1, %s434_s11   ;;  %s593_s6 = smov %s418_s7 }
  0x4f   : > { %p14_p2 = scmp.ge.s32.totalorder %s17_s11, 4   ;;  %s594_s7 = smov %s422_s8 }
  0x50   : > { %s595_s8 = smov %s505_s20  ;;  %s596_s9 = smov %s430_s10 }
  0x51   : > { %s597_s10 = smov %s599_s14  ;;  %16 = sbr.rel (!%p14_p2) target bundleno = 6 (0x6), region = 69 }
  0x56   :  { %194 = vsyncpa [#allocation3], 1 }
  0x57   :  { %196 = vsyncpa [#allocation3 + $0x1], 1 }
  0x58   :  { %197 = vsyncpa [#allocation4], 1 }
  0x59   :  { %199 = vsyncpa [#allocation4 + $0x1], 1 }

</bundles_post_ra>
